<compile_context>
chip_gen: v5e
topology: v5e:2x2
jax: 0.10.0
libtpu: 0.0.40
codegen_flags: <defaults>
</compile_context>

<pallas_src>
import jax
import jax.numpy as jnp
from jax import lax
from jax.experimental import pallas as pl
from jax.experimental.pallas import tpu as pltpu

LN_EPS = 1e-5
TB_MAX = 128  # MXU-filling batch tile; 128 is the safe sweet spot on v5e/v6e/v7x


def _round_up(v, m):
    return ((v + m - 1) // m) * m


def _pick_tb(B):
    """Batch tile: multiple of 16 (bf16 packed sublanes), capped at TB_MAX.

    If the padded batch would collapse to a single grid step but is large
    enough to split, halve the tile so both v7x TensorCores get work under
    dimension_semantics=("parallel",).
    """
    b16 = _round_up(B, 16)
    tb = min(TB_MAX, b16)
    if b16 // tb < 2 and b16 >= 32:
        tb = max(16, ((b16 // 2) // 16) * 16)
    return tb


def _make_kernel(H, O_pad, inv_H):
    def kernel(x_ref, w1_ref, w2_ref, bias_ref, o_ref):
        # x_ref: (TB, D) bf16, w1_ref: (D, H) bf16, w2_ref: (H, O_pad) bf16,
        # bias_ref: (2, P) f32, o_ref: (TB, O_pad) bf16

        # fc1 (bf16 operands, f32 accumulate) + bias + ReLU
        h = jnp.dot(x_ref[...], w1_ref[...], preferred_element_type=jnp.float32)
        h = jnp.maximum(h + bias_ref[0:1, :H], 0.0)

        # LayerNorm (no affine), biased variance, single-pass stats:
        # the two lane reductions are independent -> overlap in the XLU slot.
        s1 = jnp.sum(h, axis=-1, keepdims=True)
        s2 = jnp.sum(h * h, axis=-1, keepdims=True)
        mean = s1 * inv_H
        var = jnp.maximum(s2 * inv_H - mean * mean, 0.0)  # guard cancellation
        h_norm = (h - mean) * lax.rsqrt(var + LN_EPS)

        # fc2 (bf16 operands, f32 accumulate) + bias, lane-dense bf16 store
        out = (
            jnp.dot(h_norm.astype(jnp.bfloat16), w2_ref[...],
                    preferred_element_type=jnp.float32)
            + bias_ref[1:2, :O_pad]
        )
        o_ref[...] = out.astype(o_ref.dtype)

    return kernel


def ntk_forward_batched(x_rows, w1, b1, w2, b2, out_dtype=jnp.bfloat16):
    """x_rows: (B, D) float32. Each row is an independent NTK forward.

    w1: (D, H), b1: (H,), w2: (H, O), b2: (O,)  (weights stored (in, out)).
    Returns (B, O) in `out_dtype` (bf16 by default; accumulation is f32).
    """
    B, D = x_rows.shape
    H = w1.shape[1]
    O = w2.shape[1]
    O_pad = _round_up(O, 128)          # lane-dense output / w2 columns
    P = max(H, O_pad)                  # packed-bias lane width

    TB = _pick_tb(B)
    B_pad = _round_up(B, TB)

    # Activations: bf16 cast only; pad rows only when actually needed
    # (avoids the zeros+set full-array HBM round trip of the old version).
    x_b = x_rows.astype(jnp.bfloat16)
    if B_pad != B:
        x_b = jnp.pad(x_b, ((0, B_pad - B), (0, 0)))

    w1_b = w1.astype(jnp.bfloat16)
    w2_b = w2.astype(jnp.bfloat16)
    if O_pad != O:
        w2_b = jnp.pad(w2_b, ((0, 0), (0, O_pad - O)))

    bias = jnp.zeros((2, P), jnp.float32)
    bias = bias.at[0, :H].set(b1.astype(jnp.float32))
    bias = bias.at[1, :O].set(b2.astype(jnp.float32))

    kernel = _make_kernel(H, O_pad, 1.0 / H)

    out = pl.pallas_call(
        kernel,
        out_shape=jax.ShapeDtypeStruct((B_pad, O_pad), out_dtype),
        grid=(B_pad // TB,),
        in_specs=[
            pl.BlockSpec((TB, D), lambda i: (i, 0)),      # batch-tiled activations
            pl.BlockSpec((D, H), lambda i: (0, 0)),       # VMEM-resident weights
            pl.BlockSpec((H, O_pad), lambda i: (0, 0)),   # VMEM-resident weights
            pl.BlockSpec((2, P), lambda i: (0, 0)),       # packed biases
        ],
        out_specs=pl.BlockSpec((TB, O_pad), lambda i: (i, 0)),
        compiler_params=pltpu.CompilerParams(
            dimension_semantics=("parallel",)),           # megacore batch split
    )(x_b, w1_b, w2_b, bias)

    if B_pad != B or O_pad != O:
        out = out[:B, :O]
    return out


def ntk_forward(x, w1, b1, w2, b2):
    """Module-faithful single-sample forward: torch.flatten(x, 0) -> (O,)."""
    D = w1.shape[0]
    return ntk_forward_batched(x.reshape(1, D), w1, b1, w2, b2)[0]


def ntk_reference(x_rows, w1, b1, w2, b2):
    """Pure-JAX reference with the same bf16-operand / f32-accumulate path."""
    xb = x_rows.astype(jnp.bfloat16)
    h = jnp.dot(xb, w1.astype(jnp.bfloat16),
                preferred_element_type=jnp.float32) + b1[None, :]
    h = jnp.maximum(h, 0.0)
    mean = jnp.mean(h, axis=-1, keepdims=True)
    var = jnp.mean((h - mean) ** 2, axis=-1, keepdims=True)
    h_norm = (h - mean) * lax.rsqrt(var + LN_EPS)
    return (jnp.dot(h_norm.astype(jnp.bfloat16), w2.astype(jnp.bfloat16),
                    preferred_element_type=jnp.float32) + b2[None, :])


if __name__ == "__main__":
    # Small, module-consistent shapes: input_size D = 256 (16x16 image),
    # hidden_size_1 H = 128, output_size O = 10; batch of 16 independent samples.
    D, H, O = 256, 128, 10
    B = 16

    key = jax.random.PRNGKey(0)
    kx, kw1, kb1, kw2, kb2 = jax.random.split(key, 5)

    x = jax.random.normal(kx, (B, 1, 16, 16), dtype=jnp.float32)
    w1 = jax.random.uniform(kw1, (D, H), minval=-1.0, maxval=1.0) / jnp.sqrt(D)
    b1 = jax.random.uniform(kb1, (H,), minval=-1.0, maxval=1.0) / jnp.sqrt(D)
    w2 = jax.random.uniform(kw2, (H, O), minval=-1.0, maxval=1.0) / jnp.sqrt(H)
    b2 = jax.random.uniform(kb2, (O,), minval=-1.0, maxval=1.0) / jnp.sqrt(H)

    x_rows = x.reshape(B, D)

    out = jax.block_until_ready(ntk_forward_batched(x_rows, w1, b1, w2, b2))
    assert out.shape == (B, O)
    assert out.dtype == jnp.bfloat16

    # Reference rounded through bf16 so the comparison matches the kernel's
    # f32-accumulate / bf16-store path; 1e-2 covers one bf16 ulp at O(1).
    ref = ntk_reference(x_rows, w1, b1, w2, b2).astype(jnp.bfloat16)
    out_f = out.astype(jnp.float32)
    ref_f = ref.astype(jnp.float32)
    assert jnp.allclose(out_f, ref_f, atol=1e-2, rtol=1e-2), (out_f, ref_f)

    # Module-faithful single-sample path (torch.flatten(x, 0)).
    single = jax.block_until_ready(ntk_forward(x[0], w1, b1, w2, b2))
    assert single.shape == (O,)
    assert jnp.allclose(single.astype(jnp.float32), out_f[0], atol=1e-2, rtol=1e-2)

    print("KERNEL_OK")
</pallas_src>

<mosaic_0001>
module attributes {stable_mosaic.version = 11 : i64} {
  func.func @kernel(%arg0: i32, %arg1: memref<16x256xbf16, #tpu.memory_space<vmem>>, %arg2: memref<256x128xbf16, #tpu.memory_space<vmem>>, %arg3: memref<128x128xbf16, #tpu.memory_space<vmem>>, %arg4: memref<2x128xf32, #tpu.memory_space<vmem>>, %arg5: memref<16x128xbf16, #tpu.memory_space<vmem>>) attributes {dimension_semantics = [#tpu.dimension_semantics<parallel>], iteration_bounds = array<i64: 1>, scalar_prefetch = 0 : i64, scratch_operands = 0 : i64, tpu.core_type = #tpu.core_type<tc>, window_params = [{transform_indices = @transform_0, window_bounds = array<i64: 16, 256>}, {pipeline_mode = #tpu.pipeline_mode<synchronous>, transform_indices = @transform_1, window_bounds = array<i64: 256, 128>}, {pipeline_mode = #tpu.pipeline_mode<synchronous>, transform_indices = @transform_2, window_bounds = array<i64: 128, 128>}, {pipeline_mode = #tpu.pipeline_mode<synchronous>, transform_indices = @transform_3, window_bounds = array<i64: 2, 128>}, {transform_indices = @transform_4, window_bounds = array<i64: 16, 128>}]} {
    %c0 = arith.constant 0 : index
    %c0_0 = arith.constant 0 : index
    %0 = vector.load %arg1[%c0, %c0_0] : memref<16x256xbf16, #tpu.memory_space<vmem>>, vector<16x256xbf16>
    %c0_1 = arith.constant 0 : index
    %c0_2 = arith.constant 0 : index
    %1 = vector.load %arg2[%c0_1, %c0_2] : memref<256x128xbf16, #tpu.memory_space<vmem>>, vector<256x128xbf16>
    %cst = arith.constant dense<0.000000e+00> : vector<16x128xf32>
    %2 = tpu.matmul %0, %1, %cst {dimension_numbers = #tpu.dot_dimension_numbers<[1], [0], [0], [1], [0, 0, 1, 1], [], []>} : vector<16x256xbf16>, vector<256x128xbf16>, vector<16x128xf32> -> vector<16x128xf32>
    %c0_3 = arith.constant 0 : index
    %c0_4 = arith.constant 0 : index
    %3 = vector.load %arg4[%c0_3, %c0_4] : memref<2x128xf32, #tpu.memory_space<vmem>>, vector<1x128xf32>
    %4 = vector.broadcast %3 : vector<1x128xf32> to vector<16x128xf32>
    %5 = arith.addf %2, %4 : vector<16x128xf32>
    %cst_5 = arith.constant 0.000000e+00 : f32
    %6 = vector.broadcast %cst_5 : f32 to vector<16x128xf32>
    %7 = arith.maximumf %5, %6 : vector<16x128xf32>
    %cst_6 = arith.constant dense<0.000000e+00> : vector<16xf32>
    %8 = vector.multi_reduction <add>, %7, %cst_6 [1] : vector<16x128xf32> to vector<16xf32>
    %9 = vector.shape_cast %8 : vector<16xf32> to vector<16x1xf32>
    %10 = arith.mulf %7, %7 : vector<16x128xf32>
    %cst_7 = arith.constant dense<0.000000e+00> : vector<16xf32>
    %11 = vector.multi_reduction <add>, %10, %cst_7 [1] : vector<16x128xf32> to vector<16xf32>
    %12 = vector.shape_cast %11 : vector<16xf32> to vector<16x1xf32>
    %cst_8 = arith.constant 7.812500e-03 : f32
    %13 = vector.broadcast %cst_8 : f32 to vector<16x1xf32>
    %14 = arith.mulf %9, %13 : vector<16x1xf32>
    %cst_9 = arith.constant 7.812500e-03 : f32
    %15 = vector.broadcast %cst_9 : f32 to vector<16x1xf32>
    %16 = arith.mulf %12, %15 : vector<16x1xf32>
    %17 = arith.mulf %14, %14 : vector<16x1xf32>
    %18 = arith.subf %16, %17 : vector<16x1xf32>
    %cst_10 = arith.constant 0.000000e+00 : f32
    %19 = vector.broadcast %cst_10 : f32 to vector<16x1xf32>
    %20 = arith.maximumf %18, %19 : vector<16x1xf32>
    %21 = vector.broadcast %14 : vector<16x1xf32> to vector<16x128xf32>
    %22 = arith.subf %7, %21 : vector<16x128xf32>
    %cst_11 = arith.constant 9.99999974E-6 : f32
    %23 = vector.broadcast %cst_11 : f32 to vector<16x1xf32>
    %24 = arith.addf %20, %23 : vector<16x1xf32>
    %25 = math.rsqrt %24 : vector<16x1xf32>
    %26 = vector.broadcast %25 : vector<16x1xf32> to vector<16x128xf32>
    %27 = arith.mulf %22, %26 : vector<16x128xf32>
    %28 = arith.truncf %27 : vector<16x128xf32> to vector<16x128xbf16>
    %c0_12 = arith.constant 0 : index
    %c0_13 = arith.constant 0 : index
    %29 = vector.load %arg3[%c0_12, %c0_13] : memref<128x128xbf16, #tpu.memory_space<vmem>>, vector<128x128xbf16>
    %cst_14 = arith.constant dense<0.000000e+00> : vector<16x128xf32>
    %30 = tpu.matmul %28, %29, %cst_14 {dimension_numbers = #tpu.dot_dimension_numbers<[1], [0], [0], [1], [0, 0, 1, 1], [], []>} : vector<16x128xbf16>, vector<128x128xbf16>, vector<16x128xf32> -> vector<16x128xf32>
    %c1 = arith.constant 1 : index
    %c0_15 = arith.constant 0 : index
    %31 = vector.load %arg4[%c1, %c0_15] : memref<2x128xf32, #tpu.memory_space<vmem>>, vector<1x128xf32>
    %32 = vector.broadcast %31 : vector<1x128xf32> to vector<16x128xf32>
    %33 = arith.addf %30, %32 : vector<16x128xf32>
    %34 = arith.truncf %33 : vector<16x128xf32> to vector<16x128xbf16>
    %c0_16 = arith.constant 0 : index
    %c0_17 = arith.constant 0 : index
    %35 = vector.load %arg5[%c0_16, %c0_17] : memref<16x128xbf16, #tpu.memory_space<vmem>>, vector<16x128xbf16>
    tpu.vector_store %arg5[%c0_16, %c0_17], %34 {strides = array<i32>} : memref<16x128xbf16, #tpu.memory_space<vmem>>, vector<16x128xbf16>,
    return
  }
  func.func @transform_0(%arg0: i32) -> (i32, i32) {
    %c0_i32 = arith.constant 0 : i32
    %c0_i32_0 = arith.constant 0 : i32
    return %arg0, %c0_i32 : i32, i32
  }
  func.func @transform_1(%arg0: i32) -> (i32, i32) {
    %c0_i32 = arith.constant 0 : i32
    %c0_i32_0 = arith.constant 0 : i32
    %c0_i32_1 = arith.constant 0 : i32
    return %c0_i32, %c0_i32_0 : i32, i32
  }
  func.func @transform_2(%arg0: i32) -> (i32, i32) {
    %c0_i32 = arith.constant 0 : i32
    %c0_i32_0 = arith.constant 0 : i32
    %c0_i32_1 = arith.constant 0 : i32
    return %c0_i32, %c0_i32_0 : i32, i32
  }
  func.func @transform_3(%arg0: i32) -> (i32, i32) {
    %c0_i32 = arith.constant 0 : i32
    %c0_i32_0 = arith.constant 0 : i32
    %c0_i32_1 = arith.constant 0 : i32
    return %c0_i32, %c0_i32_0 : i32, i32
  }
  func.func @transform_4(%arg0: i32) -> (i32, i32) {
    %c0_i32 = arith.constant 0 : i32
    %c0_i32_0 = arith.constant 0 : i32
    return %arg0, %c0_i32 : i32, i32
  }
}

</mosaic_0001>

<bundles_post_ra>
// kernel: tpu_custom_call.1
= control target key start
LH: loop header
LB: loop body
LE: loop exit
PB: predicated region body
PF: predicated region fallthrough
CT: control target
= control target key end

     0   :  { %9 = vsyncpa [#allocation3], 0  ;;  %s705_s0 = inlined_call_operand.hbm [shape: bf16[16,256], index: 0, kind: input, shape index: {}]   ;;  %s706_s1 = inlined_call_operand.hbm [shape: bf16[256,128], index: 1, kind: input, shape index: {}]   ;;  %s707_s2 = inlined_call_operand.hbm [shape: bf16[128,128], index: 2, kind: input, shape index: {}]   ;;  %s708_s3 = inlined_call_operand.vmem [shape: f32[2,128], index: 3, kind: input, shape index: {}]   ;;  %s709_s4 = inlined_call_operand.hbm [shape: bf16[16,128], index: 4, kind: output, shape index: {}]  }
   0x1   :  { %10 = vsyncpa [#allocation6], 0  ;;  %s29_s17 = sshll.u32 %s706_s1, 4  ;;  %s30_s17 = int_to_ptr.hbm [resolvable:$true] %s29_s17 }
   0x2   :  { %11 = vsyncpa [#allocation4], 0  ;;  %s639_s18 = smov [#allocation5]   ;;  %s16_s22 = sshll.u32 %s705_s0, 4  ;;  %s17_s22 = int_to_ptr.hbm [resolvable:$true] %s16_s22 }
   0x3   :  { %s31_s19 = sshll.u32 %s639_s18, 4  ;;  %s640_s23 = smov 64   ;;  %s32_s19 = int_to_ptr.vmem [resolvable:$true] %s31_s19 }
   0x4   :  { %s641_s24 = smov 4   ;;  %s642_s25 = smov [#allocation2]  }
   0x5   :  { %37 = dma.hbm_to_vmem [thread:$0]  %s30_s17, 2048, %s32_s19, [#allocation6], %s640_s23, %s640_s23, %s641_s24  }
   0x6   :  { %s18_s26 = sshll.u32 %s642_s25, 4  ;;  %s643_s1 = smov 128   ;;  %s19_s26 = int_to_ptr.vmem [resolvable:$true] %s18_s26 }
   0x7   :  { %s644_s27 = smov 8   ;;  %s42_s30 = sshll.u32 %s707_s2, 4  ;;  %s43_s30 = int_to_ptr.hbm [resolvable:$true] %s42_s30 }
   0x8   :  { %24 = dma.hbm_to_vmem [thread:$0]  %s17_s22, 256, %s19_s26, [#allocation3], %s643_s1, %s643_s1, %s644_s27  }
   0x9   :  { %s645_s5 = smov [#allocation7]  }
   0xa   :  { %s44_s0 = sshll.u32 %s645_s5, 4  ;;  %s45_s0 = int_to_ptr.vmem [resolvable:$true] %s44_s0 }
   0xb   :  { %50 = dma.hbm_to_vmem [thread:$0]  %s43_s30, 1024, %s45_s0, [#allocation6], %s640_s23, %s640_s23, %s641_s24  }
   0xc   :  { %633 = dma.done.wait [#allocation3], 256  }
   0xd   :  { %634 = vsyncadd [#allocation3], 4294967040 }
   0xe   :  { %635 = dma.done.wait [#allocation6], 3072  }
   0xf   :  { %636 = vsyncadd [#allocation6], 4294964224  ;;  %v501_v0 = vld [vmem:[#allocation5 + $0x38] sm:$0xff]  ;;  %v500_v2 = vld [vmem:[#allocation5 + $0x30] sm:$0xff]  ;;  %s646_s9 = smov [#allocation8]   ;;  %s374_s13 = sshll.u32 %s709_s4, 4  ;;  %s375_s13 = int_to_ptr.hbm [resolvable:$true] %s374_s13 }
  0x10   :  { %v509_v1 = vld [vmem:[#allocation5 + $0x78] sm:$0xff]  ;;  %207 = vmatpush.bf16.msra.mxu0 %v501_v0  ;;  %v508_v3 = vld [vmem:[#allocation5 + $0x70] sm:$0xff]  ;;  %v499_v4 = vld [vmem:[#allocation5 + $0x28] sm:$0xff]  ;;  %s372_s10 = sshll.u32 %s646_s9, 4  ;;  %s373_s10 = int_to_ptr.vmem [resolvable:$true] %s372_s10 }
  0x11   :  { %221 = vmatpush.bf16.msra.mxu1 %v509_v1  ;;  %v507_v5 = vld [vmem:[#allocation5 + $0x68] sm:$0xff]  ;;  %v498_v6 = vld [vmem:[#allocation5 + $0x20] sm:$0xff]  ;;  %v497_v8 = vld [vmem:[#allocation5 + $0x18] sm:$0xff] }
  0x12   :  { %v506_v7 = vld [vmem:[#allocation5 + $0x60] sm:$0xff]  ;;  %v505_v9 = vld [vmem:[#allocation5 + $0x58] sm:$0xff]  ;;  %v496_v10 = vld [vmem:[#allocation5 + $0x10] sm:$0xff] }
  0x13   :  { %v504_v11 = vld [vmem:[#allocation5 + $0x50] sm:$0xff]  ;;  %v495_v12 = vld [vmem:[#allocation5 + $0x8] sm:$0xff]  ;;  %v494_v14 = vld [vmem:[#allocation5] sm:$0xff] }
  0x14   :  { %208 = vmatpush.bf16.msra.mxu0 %v500_v2  ;;  %v503_v13 = vld [vmem:[#allocation5 + $0x48] sm:$0xff]  ;;  %v502_v15 = vld [vmem:[#allocation5 + $0x40] sm:$0xff]  ;;  %v390_v16 = vld [vmem:[#allocation2] sm:$0xf] }
  0x15   :  { %222 = vmatpush.bf16.msra.mxu1 %v508_v3  ;;  %v493_v17 = vld [vmem:[#allocation2 + $0x4] sm:$0xf0]  ;;  %v492_v18 = vld [vmem:[#allocation2 + $0x4] sm:$0xf]  ;;  %v392_v19 = vld [vmem:[#allocation2 + $0x8] sm:$0xf0] }
  0x16   :  { %v391_v20 = vor.u32 %v493_v17, %v390_v16  ;;  %v395_v21 = vor.u32 %v492_v18, %v392_v19  ;;  %v531_v22 = vld [vmem:[%s708_s3] ss:$0 sm:$0xff]  ;;  %v517_v35 = vld [vmem:[#allocation7 + $0x38] sm:$0xff]  ;;  %v515_v37 = vld [vmem:[#allocation7 + $0x28] sm:$0xff] }
  0x17   :  { %350 = vmatpush.bf16.msra.mxu2 %v517_v35  ;;  %v516_v36 = vld [vmem:[#allocation7 + $0x30] sm:$0xff]  ;;  %v514_v38 = vld [vmem:[#allocation7 + $0x20] sm:$0xff]  ;;  %v513_v39 = vld [vmem:[#allocation7 + $0x18] sm:$0xff] }
  0x18   :  { %209 = vmatpush.bf16.msra.mxu0 %v499_v4  ;;  %v512_v40 = vld [vmem:[#allocation7 + $0x10] sm:$0xff]  ;;  %v511_v42 = vld [vmem:[#allocation7 + $0x8] sm:$0xff]  ;;  %v510_v45 = vld [vmem:[#allocation7] sm:$0xff] }
  0x19   :  { %223 = vmatpush.bf16.msra.mxu1 %v507_v5 }
  0x1b   :  { %351 = vmatpush.bf16.msra.mxu2 %v516_v36 }
  0x1c   :  { %210 = vmatpush.bf16.msra.mxu0 %v498_v6 }
  0x1d   :  { %224 = vmatpush.bf16.msra.mxu1 %v506_v7 }
  0x1f   :  { %352 = vmatpush.bf16.msra.mxu2 %v515_v37 }
  0x20   :  { %211 = vmatpush.bf16.msra.mxu0 %v497_v8 }
  0x21   :  { %225 = vmatpush.bf16.msra.mxu1 %v505_v9 }
  0x23   :  { %353 = vmatpush.bf16.msra.mxu2 %v514_v38 }
  0x24   :  { %212 = vmatpush.bf16.msra.mxu0 %v496_v10 }
  0x25   :  { %226 = vmatpush.bf16.msra.mxu1 %v504_v11 }
  0x27   :  { %354 = vmatpush.bf16.msra.mxu2 %v513_v39 }
  0x28   :  { %213 = vmatpush.bf16.msra.mxu0 %v495_v12 }
  0x29   :  { %227 = vmatpush.bf16.msra.mxu1 %v503_v13 }
  0x2b   :  { %355 = vmatpush.bf16.msra.mxu2 %v512_v40 }
  0x2c   :  { %214 = vmatpush.bf16.msra.mxu0 %v494_v14 }
  0x2d   :  { %228 = vmatpush.bf16.msra.mxu1 %v502_v15  ;;  %v532_v15 = vld [vmem:[%s708_s3 + $0x1] ss:$0 sm:$0xff] }
  0x2f   :  { %215 = vmatmul.bf16.vlgmr.msra.gmra.mxu0 %v391_v20  ;;  %356 = vmatpush.bf16.msra.mxu2 %v511_v42 }
  0x30   :  { %229 = vmatmul.bf16.vlgmr.msra.gmra.mxu1 %v395_v21 }
  0x33   :  { %357 = vmatpush.bf16.msra.mxu2 %v510_v45 }
  0xac   :  { %v216_v23 = vpop.f32.mrf.mxu0 }
  0xad   :  { %v230_v24 = vpop.f32.mrf.mxu1  ;;  %v217_v25 = vadd.f32 %v531_v22, %v216_v23 }
  0xaf   :  { %v231_v26 = vadd.f32 %v230_v24, %v217_v25 }
  0xb1   :  { %v690_v27 = vmax.f32 %v231_v26, 0.0 }
  0xb3   :  { %237 = vadd.xlane.f32.xlu0 %v690_v27  ;;  %v241_v28 = vmul.f32 %v690_v27, %v690_v27 }
  0xb4   :  { %v218_v29 = vpop.f32.mrf.mxu0 }
  0xb5   :  { %v219_v30 = vadd.f32 %v531_v22, %v218_v29  ;;  %243 = vadd.xlane.f32.xlu1 %v241_v28  ;;  %v232_v31 = vpop.f32.mrf.mxu1 }
  0xb7   :  { %v233_v32 = vadd.f32 %v232_v31, %v219_v30 }
  0xb9   :  { %v236_v33 = vmax.f32 %v233_v32, 0.0 }
  0xbb   :  { %239 = vadd.xlane.f32.xlu0 %v236_v33  ;;  %v242_v34 = vmul.f32 %v236_v33, %v236_v33 }
  0xbd   :  { %245 = vadd.xlane.f32.xlu1 %v242_v34 }
 0x126   :  { %v238_v41 = vpop.xlane.xlu0 %237 }
 0x127   :  { %v247_v43 = vmul.f32 0.0078125, %v238_v41 }
 0x128   :  { %v244_v44 = vpop.xlane.xlu1 %243 }
 0x129   :  { %v251_v46 = vmul.f32 %v247_v43, %v247_v43  ;;  %v249_v47 = vmul.f32 0.0078125, %v244_v44  ;;  %v257_v8 = vsub.f32 %v690_v27, %v247_v43 }
 0x12b   :  { %v253_v48 = vsub.f32 %v249_v47, %v251_v46 }
 0x12d   :  { %v255_v49 = vmax.f32 %v253_v48, 0.0 }
 0x12e   :  { %v240_v50 = vpop.xlane.xlu0 %239 }
 0x12f   :  { %v259_v51 = vadd.f32 1e-05, %v255_v49  ;;  %v248_v52 = vmul.f32 0.0078125, %v240_v50 }
 0x130   :  { %v246_v53 = vpop.xlane.xlu1 %245 }
 0x131   :  { %533 = vrsqrt.f32 %v259_v51  ;;  %v252_v54 = vmul.f32 %v248_v52, %v248_v52  ;;  %v250_v55 = vmul.f32 0.0078125, %v246_v53  ;;  %vm267_vm1 = vweird.f32 %v259_v51 }
 0x132   :  { %v258_v9 = vsub.f32 %v236_v33, %v248_v52 }
 0x133   :  { %v254_v56 = vsub.f32 %v250_v55, %v252_v54 }
 0x135   :  { %v256_v57 = vmax.f32 %v254_v56, 0.0 }
 0x137   :  { %v534_v58 = vpop.eup %533  ;;  %v260_v59 = vadd.f32 1e-05, %v256_v57 }
 0x138   :  { %v262_v60 = vmul.f32 %v534_v58, %v259_v51  ;;  %vm268_vm0 = vweird.f32 %v534_v58 }
 0x139   :  { %535 = vrsqrt.f32 %v260_v59  ;;  %vm269_vm3 = vmor %vm267_vm1, %vm268_vm0  ;;  %vm277_vm4 = vweird.f32 %v260_v59 }
 0x13a   :  { %v263_v61 = vmul.f32 %v534_v58, %v262_v60 }
 0x13c   :  { %v264_v62 = vmul.f32 0.5, %v263_v61 }
 0x13e   :  { %v265_v1 = vsub.f32 1.5, %v264_v62 }
 0x13f   :  { %v536_v63 = vpop.eup %535 }
 0x140   :  { %v272_v0 = vmul.f32 %v536_v63, %v260_v59  ;;  %v266_v4 = vmul.f32 %v534_v58, %v265_v1  ;;  %vm278_vm2 = vweird.f32 %v536_v63 }
 0x141   :  { %vm279_vm5 = vmor %vm277_vm4, %vm278_vm2 }
 0x142   :  { %v273_v2 = vmul.f32 %v536_v63, %v272_v0  ;;  %v270_v6 = vsel %vm269_vm3, %v534_v58, %v266_v4 }
 0x143   :  { %v281_v11 = vmul.f32 %v270_v6, %v257_v8 }
 0x144   :  { %v274_v3 = vmul.f32 0.5, %v273_v2 }
 0x146   :  { %v275_v5 = vsub.f32 1.5, %v274_v3 }
 0x148   :  { %v276_v7 = vmul.f32 %v536_v63, %v275_v5 }
 0x14a   :  { %v280_v10 = vsel %vm279_vm5, %v536_v63, %v276_v7 }
 0x14b   :  { %v282_v12 = vmul.f32 %v280_v10, %v258_v9 }
 0x14d   :  { %v283_v13 = vpack.c.bf16 %v282_v12, %v281_v11 }
 0x14f   :  { %358 = vmatmul.bf16.vlgmr.msra.gmra.mxu2 %v283_v13 }
 0x1d2   :  { %v359_v14 = vpop.f32.mrf.mxu2 }
 0x1d3   :  { %v360_v17 = vadd.f32 %v532_v15, %v359_v14 }
 0x1da   :  { %v361_v16 = vpop.f32.mrf.mxu2 }
 0x1db   :  { %v362_v18 = vadd.f32 %v532_v15, %v361_v16 }
 0x1dd   :  { %v521_v19 = vpack.c.bf16 %v362_v18, %v360_v17 }
 0x1df   :  { %522 = vst [vmem:[#allocation8] sm:$0xff] %v521_v19  }
 0x1e0   :  { %380 = dma.vmem_to_hbm [thread:$0]  %s373_s10, 128, %s375_s13, [#allocation4], %s640_s23, %s640_s23, %s641_s24  }
 0x1e1   :  { %637 = dma.done.wait [#allocation4], 128  }
 0x1e2   :  { %638 = vsyncadd [#allocation4], 4294967168 }
 0x1e3   :  { %385 = vsyncpa [#allocation3], 1 }
 0x1e4   :  { %386 = vsyncpa [#allocation6], 1 }
 0x1e5   :  { %387 = vsyncpa [#allocation4], 1 }

</bundles_post_ra>
